<compile_context>
chip_gen: v7x
topology: tpu7x:2x2x1
jax: 0.10.0
libtpu: 0.0.40
codegen_flags: <defaults>
</compile_context>

<pallas_src>
import functools

import jax
import jax.numpy as jnp
from jax.experimental import pallas as pl
from jax.experimental.pallas import tpu as pltpu


def _round_up(x, m):
    return ((x + m - 1) // m) * m


def _dtype_bytes(dt):
    return jnp.dtype(dt).itemsize


# ----------------------------------------------------------------------------
# Per-generation VMEM budget (per TensorCore).
# ----------------------------------------------------------------------------
def _vmem_physical_bytes():
    try:
        info = pltpu.get_tpu_info()
        cap = getattr(info, "vmem_capacity_bytes", None)
        if cap:
            return int(cap)
    except Exception:
        pass
    try:
        kind = jax.devices()[0].device_kind.lower()
    except Exception:
        kind = ""
    if any(t in kind for t in ("v4", "v5", "v6")):
        return 128 << 20
    return 64 << 20  # conservative default (v7x: 64 MiB per TensorCore)


def _vmem_budget_bytes():
    # Headroom for Mosaic internal scratch. This is a PER-TensorCore budget:
    # under dimension_semantics=("parallel",) the resident params are
    # replicated into both TCs' VMEM on v7x.
    return int(_vmem_physical_bytes() * 0.80)


# ----------------------------------------------------------------------------
# Fused whole-MLP kernel.
# ----------------------------------------------------------------------------
def _fused_mlp_kernel(x_ref, *refs, num_layers, act_func, compute_dtype):
    """refs = (w0, b0, w1, b1, ..., w_{L-1}, b_{L-1}, o_ref).

    x_ref : [B_tile, in_dim]          (raw input width, full-dim block)
    w_i   : [in_w_i, out_pad_i]       (pre-transposed, lane-padded, compute dtype)
    b_i   : [1, out_pad_i]            (f32)
    o_ref : [B_tile, out_pad_last]
    Padded weight rows/cols and bias entries are zero; tanh(0)=relu(0)=0, so the
    real output columns are exact.
    """
    o_ref = refs[-1]
    params = refs[:-1]

    h = x_ref[...].astype(compute_dtype)
    for li in range(num_layers):
        w = params[2 * li][...]
        b = params[2 * li + 1][...]
        # MXU matmul with f32 accumulation; bias added on the f32 accumulator.
        y = jnp.dot(h, w, preferred_element_type=jnp.float32)
        y = y + b.astype(jnp.float32)
        if li < num_layers - 1:
            # Hidden layer: activation in the compute dtype (bf16 EUP on
            # v6e/v7x; compiler widens on v5e). dropout(p=0) == identity.
            a = y.astype(compute_dtype)
            h = jnp.tanh(a) if act_func == "tanh" else jnp.maximum(a, 0)
        else:
            h = y
    o_ref[...] = h.astype(o_ref.dtype)


_SINGLE_BUFFER_PARAMS_OK = [True]  # flips to False if Buffered(1) is rejected


def fused_mlp_forward(x, kernel_params, out_dim, *, act_func,
                      compute_dtype=jnp.bfloat16, batch_tile=512):
    batch, in_dim = x.shape
    num_layers = len(kernel_params)
    out_widths = [w.shape[1] for (w, _) in kernel_params]
    out_pad = out_widths[-1]
    out_dtype = jnp.float32

    param_bytes = sum(w.size * _dtype_bytes(w.dtype) + b.size * _dtype_bytes(b.dtype)
                      for (w, b) in kernel_params)
    budget = _vmem_budget_bytes()
    stream_bytes = max(_dtype_bytes(x.dtype), _dtype_bytes(compute_dtype))
    batch8 = _round_up(batch, 8)

    def vmem_need(bt, param_bufs):
        x_buf = 2 * bt * in_dim * stream_bytes            # double-buffered x tile
        o_buf = 2 * bt * out_pad * _dtype_bytes(out_dtype)  # double-buffered out tile
        widest = max(out_widths)
        inter = 3 * bt * widest * 4                        # live f32 intermediates
        return x_buf + o_buf + param_bufs * param_bytes + inter

    # ---- adaptive batch tile ------------------------------------------------
    b_tile = min(_round_up(batch_tile, 8), batch8)
    # (a) at least 2 grid steps when there is enough batch (both v7x TCs work)
    while batch8 >= 16 and pl.cdiv(batch8, b_tile) < 2 and b_tile > 8:
        b_tile = max(8, _round_up(b_tile // 2, 8))
    # (b) keep batch-padding waste under ~10%
    while b_tile > 8 and (pl.cdiv(batch8, b_tile) * b_tile - batch8
                          > max(8, batch8 // 10)):
        b_tile = max(8, _round_up(b_tile // 2, 8))
    # (c) fit the per-TC VMEM budget with single-buffered params
    while b_tile > 8 and vmem_need(b_tile, 1) > budget:
        b_tile = max(8, _round_up(b_tile // 2, 8))

    if vmem_need(b_tile, 1) > budget:
        # TODO(synk): an in-kernel pltpu.emit_pipeline over weight chunks would
        # keep the fused structure for very wide layers; fall back to
        # layer-by-layer tiled matmuls for now.
        return _layerwise_forward(x, kernel_params, out_dim, act_func=act_func,
                                  compute_dtype=compute_dtype,
                                  batch_tile=batch_tile)

    b_pad = pl.cdiv(batch8, b_tile) * b_tile
    grid = (b_pad // b_tile,)

    # Input glue: no padded copy when none is needed (cast happens in-kernel);
    # if batch padding is required, build it directly in the compute dtype so
    # the extra HBM pass is half-width.
    if b_pad == batch:
        x_in = x
    else:
        x_in = jnp.pad(x.astype(compute_dtype), ((0, b_pad - batch), (0, 0)))

    def build_specs(single_buffer_params):
        in_specs = [pl.BlockSpec((b_tile, in_dim), lambda i: (i, 0))]
        for (w, b) in kernel_params:
            if single_buffer_params:
                in_specs.append(pl.BlockSpec(w.shape, lambda i: (0, 0),
                                             pipeline_mode=pl.Buffered(1)))
                in_specs.append(pl.BlockSpec(b.shape, lambda i: (0, 0),
                                             pipeline_mode=pl.Buffered(1)))
            else:
                in_specs.append(pl.BlockSpec(w.shape, lambda i: (0, 0)))
                in_specs.append(pl.BlockSpec(b.shape, lambda i: (0, 0)))
        return in_specs

    # Cost hint so XLA schedules the surrounding glue sensibly.
    k_widths = [in_dim] + out_widths[:-1]
    flops = 2 * b_pad * sum(k * n for k, n in zip(k_widths, out_widths))
    transcendentals = b_pad * sum(out_widths[:-1]) if act_func == "tanh" else 0
    bytes_accessed = (b_pad * in_dim * _dtype_bytes(x_in.dtype) + param_bytes
                      + b_pad * out_pad * _dtype_bytes(out_dtype))
    cost = pl.CostEstimate(flops=int(flops),
                           transcendentals=int(transcendentals),
                           bytes_accessed=int(bytes_accessed))

    kernel = functools.partial(_fused_mlp_kernel, num_layers=num_layers,
                               act_func=act_func, compute_dtype=compute_dtype)
    flat_inputs = [x_in]
    for (w, b) in kernel_params:
        flat_inputs.extend((w, b))

    def run(single_buffer_params):
        param_bufs = 1 if single_buffer_params else 2
        vmem_limit = min(budget,
                         max(32 << 20,
                             int(vmem_need(b_tile, param_bufs) * 1.25) + (4 << 20)))
        return pl.pallas_call(
            kernel,
            out_shape=jax.ShapeDtypeStruct((b_pad, out_pad), out_dtype),
            grid=grid,
            in_specs=build_specs(single_buffer_params),
            out_specs=pl.BlockSpec((b_tile, out_pad), lambda i: (i, 0)),
            compiler_params=pltpu.CompilerParams(
                dimension_semantics=("parallel",),
                vmem_limit_bytes=vmem_limit),
            cost_estimate=cost,
        )(*flat_inputs)

    if _SINGLE_BUFFER_PARAMS_OK[0]:
        try:
            out_padded = run(True)
        except Exception:
            _SINGLE_BUFFER_PARAMS_OK[0] = False
            out_padded = run(False)
    else:
        out_padded = run(False)

    return out_padded[:batch, :out_dim]


# ----------------------------------------------------------------------------
# Layer-wise fallback: one tiled-matmul pallas_call per layer (M, N, K grid).
# Used when the resident-weights plan exceeds the VMEM budget.
# ----------------------------------------------------------------------------
def _pick_tile(dim, cap=512):
    if dim <= cap or dim % 128 != 0:
        return dim            # full-dim block (always legal)
    for t in (512, 256, 128):
        if t <= cap and dim % t == 0:
            return t
    return dim


def _layer_kernel(x_ref, w_ref, b_ref, o_ref, acc_ref, *, apply_act, act_func,
                  compute_dtype):
    k = pl.program_id(2)

    @pl.when(k == 0)
    def _():
        acc_ref[...] = jnp.broadcast_to(b_ref[...].astype(jnp.float32),
                                        acc_ref.shape)

    acc_ref[...] += jnp.dot(x_ref[...].astype(compute_dtype), w_ref[...],
                            preferred_element_type=jnp.float32)

    @pl.when(k == pl.num_programs(2) - 1)
    def _():
        y = acc_ref[...]
        if apply_act:
            y = y.astype(compute_dtype)
            y = jnp.tanh(y) if act_func == "tanh" else jnp.maximum(y, 0)
        o_ref[...] = y.astype(o_ref.dtype)


def _layer_forward(h, w, b, *, apply_act, act_func, compute_dtype, out_dtype,
                   b_tile):
    m, k_dim = h.shape
    _, n_dim = w.shape
    tm = min(b_tile, m)
    tk = _pick_tile(k_dim)
    tn = _pick_tile(n_dim)
    grid = (m // tm, n_dim // tn, k_dim // tk)
    kernel = functools.partial(_layer_kernel, apply_act=apply_act,
                               act_func=act_func, compute_dtype=compute_dtype)
    return pl.pallas_call(
        kernel,
        out_shape=jax.ShapeDtypeStruct((m, n_dim), out_dtype),
        grid=grid,
        in_specs=[pl.BlockSpec((tm, tk), lambda i, j, kk: (i, kk)),
                  pl.BlockSpec((tk, tn), lambda i, j, kk: (kk, j)),
                  pl.BlockSpec((1, tn), lambda i, j, kk: (0, j))],
        out_specs=pl.BlockSpec((tm, tn), lambda i, j, kk: (i, j)),
        scratch_shapes=[pltpu.VMEM((tm, tn), jnp.float32)],
        compiler_params=pltpu.CompilerParams(
            dimension_semantics=("parallel", "parallel", "arbitrary"),
            vmem_limit_bytes=_vmem_budget_bytes()),
    )(h, w, b)


def _layerwise_forward(x, kernel_params, out_dim, *, act_func, compute_dtype,
                       batch_tile):
    batch = x.shape[0]
    batch8 = _round_up(batch, 8)
    tm = min(_round_up(batch_tile, 8), batch8)
    while batch8 >= 16 and pl.cdiv(batch8, tm) < 2 and tm > 8:
        tm = max(8, _round_up(tm // 2, 8))
    m_pad = pl.cdiv(batch8, tm) * tm
    h = x if m_pad == batch else jnp.pad(x, ((0, m_pad - batch), (0, 0)))

    num_layers = len(kernel_params)
    for li, (w, b) in enumerate(kernel_params):
        last = li == num_layers - 1
        h = _layer_forward(h, w, b, apply_act=not last, act_func=act_func,
                           compute_dtype=compute_dtype,
                           out_dtype=(jnp.float32 if last else compute_dtype),
                           b_tile=tm)
    return h[:batch, :out_dim]


# ----------------------------------------------------------------------------
# Model wrapper mirroring PyTorch MLP_Model's forward pass.
# ----------------------------------------------------------------------------
class MLPModelPallas:
    def __init__(self, layer_sizes, output_dim=2, dropout_p=0.0, act_func="tanh",
                 key=jax.random.PRNGKey(0), compute_dtype=jnp.bfloat16,
                 batch_tile=512, force_layerwise=False):
        assert act_func in ("tanh", "relu")
        assert len(layer_sizes) >= 2
        # TODO(synk): training-mode dropout (p > 0) would need in-kernel
        # pltpu.prng_seed/prng_random_bits + 1/(1-p) scaling; p = 0 is identity.
        assert dropout_p == 0.0, "only inference-mode dropout (p=0) is implemented"
        self.act_func = act_func
        self.output_dim = output_dim
        self.compute_dtype = compute_dtype
        self.batch_tile = batch_tile
        self.force_layerwise = force_layerwise

        dims = list(layer_sizes) + [output_dim]
        # Hidden/output feature widths lane-padded (multiple of 128) -> every
        # matmul output and the final store are lane-dense; the raw input width
        # is consumed as-is (no wrapper-side feature padding).
        self.params = []          # raw (w [out, in], b [out]) for reference use
        self.kernel_params = []   # pre-transposed, lane-padded, compute dtype
        in_w = dims[0]
        for i in range(len(dims) - 1):
            fan_in, fan_out = dims[i], dims[i + 1]
            out_w = _round_up(fan_out, 128)
            key, kw, kb = jax.random.split(key, 3)
            bound = 1.0 / float(fan_in) ** 0.5
            w = jax.random.uniform(kw, (fan_out, fan_in), jnp.float32,
                                   minval=-bound, maxval=bound)
            b = jax.random.uniform(kb, (fan_out,), jnp.float32,
                                   minval=-bound, maxval=bound)
            self.params.append((w, b))

            w_pad = (jnp.zeros((in_w, out_w), jnp.float32)
                     .at[:fan_in, :fan_out].set(w.T)).astype(compute_dtype)
            b_pad = jnp.zeros((1, out_w), jnp.float32).at[0, :fan_out].set(b)
            self.kernel_params.append((w_pad, b_pad))
            in_w = out_w

    def __call__(self, x):
        if self.force_layerwise:
            return _layerwise_forward(x, self.kernel_params, self.output_dim,
                                      act_func=self.act_func,
                                      compute_dtype=self.compute_dtype,
                                      batch_tile=self.batch_tile)
        return fused_mlp_forward(x, self.kernel_params, self.output_dim,
                                 act_func=self.act_func,
                                 compute_dtype=self.compute_dtype,
                                 batch_tile=self.batch_tile)


if __name__ == "__main__":
    key = jax.random.PRNGKey(0)
    layer_sizes = [32, 64, 48]   # input 32, two hidden layers (64, 48)
    output_dim = 2
    batch = 48                   # exercises a multi-step batch grid

    k_in, k_model = jax.random.split(key)
    x = jax.random.normal(k_in, (batch, layer_sizes[0]), jnp.float32)

    def reference(params, xx, act):
        h = xx
        for (w, b) in params[:-1]:
            h = h @ w.T + b
            h = jnp.tanh(h) if act == "tanh" else jnp.maximum(h, 0.0)
        w, b = params[-1]
        return h @ w.T + b

    # 1) default path: bf16 compute, f32 accumulation (bf16 tolerance expected)
    model = MLPModelPallas(layer_sizes, output_dim=output_dim, act_func="tanh",
                           key=k_model)
    out = jax.block_until_ready(model(x))
    ref = reference(model.params, x, "tanh")
    assert out.shape == (batch, output_dim)
    assert jnp.allclose(out, ref, atol=5e-2, rtol=5e-2)

    # 2) f32 compute path: tight tolerance (exact real columns)
    model_f32 = MLPModelPallas(layer_sizes, output_dim=output_dim,
                               act_func="tanh", key=k_model,
                               compute_dtype=jnp.float32)
    out_f32 = jax.block_until_ready(model_f32(x))
    ref_f32 = reference(model_f32.params, x, "tanh")
    assert jnp.allclose(out_f32, ref_f32, atol=1e-5, rtol=1e-5)

    # 3) relu branch
    model_relu = MLPModelPallas(layer_sizes, output_dim=output_dim,
                                act_func="relu", key=k_model,
                                compute_dtype=jnp.float32)
    out_relu = jax.block_until_ready(model_relu(x))
    ref_relu = reference(model_relu.params, x, "relu")
    assert jnp.allclose(out_relu, ref_relu, atol=1e-5, rtol=1e-5)

    # 4) layer-wise fallback path (kept tested even though not needed here)
    model_lw = MLPModelPallas(layer_sizes, output_dim=output_dim,
                              act_func="tanh", key=k_model,
                              compute_dtype=jnp.float32, force_layerwise=True)
    out_lw = jax.block_until_ready(model_lw(x))
    assert jnp.allclose(out_lw, ref_f32, atol=1e-5, rtol=1e-5)

    print("KERNEL_OK")
</pallas_src>

<mosaic_0001>
module attributes {stable_mosaic.version = 11 : i64} {
  func.func @_fused_mlp_kernel(%arg0: i32, %arg1: memref<24x32xf32, #tpu.memory_space<vmem>>, %arg2: memref<32x128xbf16, #tpu.memory_space<vmem>>, %arg3: memref<1x128xf32, #tpu.memory_space<vmem>>, %arg4: memref<128x128xbf16, #tpu.memory_space<vmem>>, %arg5: memref<1x128xf32, #tpu.memory_space<vmem>>, %arg6: memref<128x128xbf16, #tpu.memory_space<vmem>>, %arg7: memref<1x128xf32, #tpu.memory_space<vmem>>, %arg8: memref<24x128xf32, #tpu.memory_space<vmem>>) attributes {dimension_semantics = [#tpu.dimension_semantics<parallel>], iteration_bounds = array<i64: 2>, scalar_prefetch = 0 : i64, scratch_operands = 0 : i64, tpu.core_type = #tpu.core_type<tc>, window_params = [{transform_indices = @transform_0, window_bounds = array<i64: 24, 32>}, {pipeline_mode = #tpu.pipeline_mode<synchronous>, transform_indices = @transform_1, window_bounds = array<i64: 32, 128>}, {pipeline_mode = #tpu.pipeline_mode<synchronous>, transform_indices = @transform_2, window_bounds = array<i64: 1, 128>}, {pipeline_mode = #tpu.pipeline_mode<synchronous>, transform_indices = @transform_3, window_bounds = array<i64: 128, 128>}, {pipeline_mode = #tpu.pipeline_mode<synchronous>, transform_indices = @transform_4, window_bounds = array<i64: 1, 128>}, {pipeline_mode = #tpu.pipeline_mode<synchronous>, transform_indices = @transform_5, window_bounds = array<i64: 128, 128>}, {pipeline_mode = #tpu.pipeline_mode<synchronous>, transform_indices = @transform_6, window_bounds = array<i64: 1, 128>}, {transform_indices = @transform_7, window_bounds = array<i64: 24, 128>}]} {
    %c0 = arith.constant 0 : index
    %c0_0 = arith.constant 0 : index
    %0 = vector.load %arg1[%c0, %c0_0] : memref<24x32xf32, #tpu.memory_space<vmem>>, vector<24x32xf32>
    %1 = arith.truncf %0 : vector<24x32xf32> to vector<24x32xbf16>
    %c0_1 = arith.constant 0 : index
    %c0_2 = arith.constant 0 : index
    %2 = vector.load %arg2[%c0_1, %c0_2] : memref<32x128xbf16, #tpu.memory_space<vmem>>, vector<32x128xbf16>
    %c0_3 = arith.constant 0 : index
    %c0_4 = arith.constant 0 : index
    %3 = vector.load %arg3[%c0_3, %c0_4] : memref<1x128xf32, #tpu.memory_space<vmem>>, vector<1x128xf32>
    %cst = arith.constant dense<0.000000e+00> : vector<24x128xf32>
    %4 = tpu.matmul %1, %2, %cst {dimension_numbers = #tpu.dot_dimension_numbers<[1], [0], [0], [1], [0, 0, 1, 1], [], []>} : vector<24x32xbf16>, vector<32x128xbf16>, vector<24x128xf32> -> vector<24x128xf32>
    %5 = vector.broadcast %3 : vector<1x128xf32> to vector<24x128xf32>
    %6 = arith.addf %4, %5 : vector<24x128xf32>
    %7 = arith.truncf %6 : vector<24x128xf32> to vector<24x128xbf16>
    %8 = math.tanh %7 : vector<24x128xbf16>
    %c0_5 = arith.constant 0 : index
    %c0_6 = arith.constant 0 : index
    %9 = vector.load %arg4[%c0_5, %c0_6] : memref<128x128xbf16, #tpu.memory_space<vmem>>, vector<128x128xbf16>
    %c0_7 = arith.constant 0 : index
    %c0_8 = arith.constant 0 : index
    %10 = vector.load %arg5[%c0_7, %c0_8] : memref<1x128xf32, #tpu.memory_space<vmem>>, vector<1x128xf32>
    %cst_9 = arith.constant dense<0.000000e+00> : vector<24x128xf32>
    %11 = tpu.matmul %8, %9, %cst_9 {dimension_numbers = #tpu.dot_dimension_numbers<[1], [0], [0], [1], [0, 0, 1, 1], [], []>} : vector<24x128xbf16>, vector<128x128xbf16>, vector<24x128xf32> -> vector<24x128xf32>
    %12 = vector.broadcast %10 : vector<1x128xf32> to vector<24x128xf32>
    %13 = arith.addf %11, %12 : vector<24x128xf32>
    %14 = arith.truncf %13 : vector<24x128xf32> to vector<24x128xbf16>
    %15 = math.tanh %14 : vector<24x128xbf16>
    %c0_10 = arith.constant 0 : index
    %c0_11 = arith.constant 0 : index
    %16 = vector.load %arg6[%c0_10, %c0_11] : memref<128x128xbf16, #tpu.memory_space<vmem>>, vector<128x128xbf16>
    %c0_12 = arith.constant 0 : index
    %c0_13 = arith.constant 0 : index
    %17 = vector.load %arg7[%c0_12, %c0_13] : memref<1x128xf32, #tpu.memory_space<vmem>>, vector<1x128xf32>
    %cst_14 = arith.constant dense<0.000000e+00> : vector<24x128xf32>
    %18 = tpu.matmul %15, %16, %cst_14 {dimension_numbers = #tpu.dot_dimension_numbers<[1], [0], [0], [1], [0, 0, 1, 1], [], []>} : vector<24x128xbf16>, vector<128x128xbf16>, vector<24x128xf32> -> vector<24x128xf32>
    %19 = vector.broadcast %17 : vector<1x128xf32> to vector<24x128xf32>
    %20 = arith.addf %18, %19 : vector<24x128xf32>
    %c0_15 = arith.constant 0 : index
    %c0_16 = arith.constant 0 : index
    %21 = vector.load %arg8[%c0_15, %c0_16] : memref<24x128xf32, #tpu.memory_space<vmem>>, vector<24x128xf32>
    tpu.vector_store %arg8[%c0_15, %c0_16], %20 {strides = array<i32>} : memref<24x128xf32, #tpu.memory_space<vmem>>, vector<24x128xf32>,
    return
  }
  func.func @transform_0(%arg0: i32) -> (i32, i32) {
    %c0_i32 = arith.constant 0 : i32
    %c0_i32_0 = arith.constant 0 : i32
    return %arg0, %c0_i32 : i32, i32
  }
  func.func @transform_1(%arg0: i32) -> (i32, i32) {
    %c0_i32 = arith.constant 0 : i32
    %c0_i32_0 = arith.constant 0 : i32
    %c0_i32_1 = arith.constant 0 : i32
    return %c0_i32, %c0_i32_0 : i32, i32
  }
  func.func @transform_2(%arg0: i32) -> (i32, i32) {
    %c0_i32 = arith.constant 0 : i32
    %c0_i32_0 = arith.constant 0 : i32
    %c0_i32_1 = arith.constant 0 : i32
    return %c0_i32, %c0_i32_0 : i32, i32
  }
  func.func @transform_3(%arg0: i32) -> (i32, i32) {
    %c0_i32 = arith.constant 0 : i32
    %c0_i32_0 = arith.constant 0 : i32
    %c0_i32_1 = arith.constant 0 : i32
    return %c0_i32, %c0_i32_0 : i32, i32
  }
  func.func @transform_4(%arg0: i32) -> (i32, i32) {
    %c0_i32 = arith.constant 0 : i32
    %c0_i32_0 = arith.constant 0 : i32
    %c0_i32_1 = arith.constant 0 : i32
    return %c0_i32, %c0_i32_0 : i32, i32
  }
  func.func @transform_5(%arg0: i32) -> (i32, i32) {
    %c0_i32 = arith.constant 0 : i32
    %c0_i32_0 = arith.constant 0 : i32
    %c0_i32_1 = arith.constant 0 : i32
    return %c0_i32, %c0_i32_0 : i32, i32
  }
  func.func @transform_6(%arg0: i32) -> (i32, i32) {
    %c0_i32 = arith.constant 0 : i32
    %c0_i32_0 = arith.constant 0 : i32
    %c0_i32_1 = arith.constant 0 : i32
    return %c0_i32, %c0_i32_0 : i32, i32
  }
  func.func @transform_7(%arg0: i32) -> (i32, i32) {
    %c0_i32 = arith.constant 0 : i32
    %c0_i32_0 = arith.constant 0 : i32
    return %arg0, %c0_i32 : i32, i32
  }
}

module attributes {stable_mosaic.version = 11 : i64} {
  func.func @_fused_mlp_kernel(%arg0: i32, %arg1: memref<24x32xf32, #tpu.memory_space<vmem>>, %arg2: memref<32x128xbf16, #tpu.memory_space<vmem>>, %arg3: memref<1x128xf32, #tpu.memory_space<vmem>>, %arg4: memref<128x128xbf16, #tpu.memory_space<vmem>>, %arg5: memref<1x128xf32, #tpu.memory_space<vmem>>, %arg6: memref<128x128xbf16, #tpu.memory_space<vmem>>, %arg7: memref<1x128xf32, #tpu.memory_space<vmem>>, %arg8: memref<24x128xf32, #tpu.memory_space<vmem>>) attributes {dimension_semantics = [#tpu.dimension_semantics<parallel>], iteration_bounds = array<i64: 2>, scalar_prefetch = 0 : i64, scratch_operands = 0 : i64, tpu.core_type = #tpu.core_type<tc>, window_params = [{transform_indices = @transform_0, window_bounds = array<i64: 24, 32>}, {pipeline_mode = #tpu.pipeline_mode<synchronous>, transform_indices = @transform_1, window_bounds = array<i64: 32, 128>}, {pipeline_mode = #tpu.pipeline_mode<synchronous>, transform_indices = @transform_2, window_bounds = array<i64: 1, 128>}, {pipeline_mode = #tpu.pipeline_mode<synchronous>, transform_indices = @transform_3, window_bounds = array<i64: 128, 128>}, {pipeline_mode = #tpu.pipeline_mode<synchronous>, transform_indices = @transform_4, window_bounds = array<i64: 1, 128>}, {pipeline_mode = #tpu.pipeline_mode<synchronous>, transform_indices = @transform_5, window_bounds = array<i64: 128, 128>}, {pipeline_mode = #tpu.pipeline_mode<synchronous>, transform_indices = @transform_6, window_bounds = array<i64: 1, 128>}, {transform_indices = @transform_7, window_bounds = array<i64: 24, 128>}]} {
    %c0 = arith.constant 0 : index
    %c0_0 = arith.constant 0 : index
    %0 = vector.load %arg1[%c0, %c0_0] : memref<24x32xf32, #tpu.memory_space<vmem>>, vector<24x32xf32>
    %1 = arith.truncf %0 : vector<24x32xf32> to vector<24x32xbf16>
    %c0_1 = arith.constant 0 : index
    %c0_2 = arith.constant 0 : index
    %2 = vector.load %arg2[%c0_1, %c0_2] : memref<32x128xbf16, #tpu.memory_space<vmem>>, vector<32x128xbf16>
    %c0_3 = arith.constant 0 : index
    %c0_4 = arith.constant 0 : index
    %3 = vector.load %arg3[%c0_3, %c0_4] : memref<1x128xf32, #tpu.memory_space<vmem>>, vector<1x128xf32>
    %cst = arith.constant dense<0.000000e+00> : vector<24x128xf32>
    %4 = tpu.matmul %1, %2, %cst {dimension_numbers = #tpu.dot_dimension_numbers<[1], [0], [0], [1], [0, 0, 1, 1], [], []>} : vector<24x32xbf16>, vector<32x128xbf16>, vector<24x128xf32> -> vector<24x128xf32>
    %5 = vector.broadcast %3 : vector<1x128xf32> to vector<24x128xf32>
    %6 = arith.addf %4, %5 : vector<24x128xf32>
    %7 = arith.truncf %6 : vector<24x128xf32> to vector<24x128xbf16>
    %8 = math.tanh %7 : vector<24x128xbf16>
    %c0_5 = arith.constant 0 : index
    %c0_6 = arith.constant 0 : index
    %9 = vector.load %arg4[%c0_5, %c0_6] : memref<128x128xbf16, #tpu.memory_space<vmem>>, vector<128x128xbf16>
    %c0_7 = arith.constant 0 : index
    %c0_8 = arith.constant 0 : index
    %10 = vector.load %arg5[%c0_7, %c0_8] : memref<1x128xf32, #tpu.memory_space<vmem>>, vector<1x128xf32>
    %cst_9 = arith.constant dense<0.000000e+00> : vector<24x128xf32>
    %11 = tpu.matmul %8, %9, %cst_9 {dimension_numbers = #tpu.dot_dimension_numbers<[1], [0], [0], [1], [0, 0, 1, 1], [], []>} : vector<24x128xbf16>, vector<128x128xbf16>, vector<24x128xf32> -> vector<24x128xf32>
    %12 = vector.broadcast %10 : vector<1x128xf32> to vector<24x128xf32>
    %13 = arith.addf %11, %12 : vector<24x128xf32>
    %14 = arith.truncf %13 : vector<24x128xf32> to vector<24x128xbf16>
    %15 = math.tanh %14 : vector<24x128xbf16>
    %c0_10 = arith.constant 0 : index
    %c0_11 = arith.constant 0 : index
    %16 = vector.load %arg6[%c0_10, %c0_11] : memref<128x128xbf16, #tpu.memory_space<vmem>>, vector<128x128xbf16>
    %c0_12 = arith.constant 0 : index
    %c0_13 = arith.constant 0 : index
    %17 = vector.load %arg7[%c0_12, %c0_13] : memref<1x128xf32, #tpu.memory_space<vmem>>, vector<1x128xf32>
    %cst_14 = arith.constant dense<0.000000e+00> : vector<24x128xf32>
    %18 = tpu.matmul %15, %16, %cst_14 {dimension_numbers = #tpu.dot_dimension_numbers<[1], [0], [0], [1], [0, 0, 1, 1], [], []>} : vector<24x128xbf16>, vector<128x128xbf16>, vector<24x128xf32> -> vector<24x128xf32>
    %19 = vector.broadcast %17 : vector<1x128xf32> to vector<24x128xf32>
    %20 = arith.addf %18, %19 : vector<24x128xf32>
    %c0_15 = arith.constant 0 : index
    %c0_16 = arith.constant 0 : index
    %21 = vector.load %arg8[%c0_15, %c0_16] : memref<24x128xf32, #tpu.memory_space<vmem>>, vector<24x128xf32>
    tpu.vector_store %arg8[%c0_15, %c0_16], %20 {strides = array<i32>} : memref<24x128xf32, #tpu.memory_space<vmem>>, vector<24x128xf32>,
    return
  }
  func.func @transform_0(%arg0: i32) -> (i32, i32) {
    %c0_i32 = arith.constant 0 : i32
    %c0_i32_0 = arith.constant 0 : i32
    return %arg0, %c0_i32 : i32, i32
  }
  func.func @transform_1(%arg0: i32) -> (i32, i32) {
    %c0_i32 = arith.constant 0 : i32
    %c0_i32_0 = arith.constant 0 : i32
    %c0_i32_1 = arith.constant 0 : i32
    return %c0_i32, %c0_i32_0 : i32, i32
  }
  func.func @transform_2(%arg0: i32) -> (i32, i32) {
    %c0_i32 = arith.constant 0 : i32
    %c0_i32_0 = arith.constant 0 : i32
    %c0_i32_1 = arith.constant 0 : i32
    return %c0_i32, %c0_i32_0 : i32, i32
  }
  func.func @transform_3(%arg0: i32) -> (i32, i32) {
    %c0_i32 = arith.constant 0 : i32
    %c0_i32_0 = arith.constant 0 : i32
    %c0_i32_1 = arith.constant 0 : i32
    return %c0_i32, %c0_i32_0 : i32, i32
  }
  func.func @transform_4(%arg0: i32) -> (i32, i32) {
    %c0_i32 = arith.constant 0 : i32
    %c0_i32_0 = arith.constant 0 : i32
    %c0_i32_1 = arith.constant 0 : i32
    return %c0_i32, %c0_i32_0 : i32, i32
  }
  func.func @transform_5(%arg0: i32) -> (i32, i32) {
    %c0_i32 = arith.constant 0 : i32
    %c0_i32_0 = arith.constant 0 : i32
    %c0_i32_1 = arith.constant 0 : i32
    return %c0_i32, %c0_i32_0 : i32, i32
  }
  func.func @transform_6(%arg0: i32) -> (i32, i32) {
    %c0_i32 = arith.constant 0 : i32
    %c0_i32_0 = arith.constant 0 : i32
    %c0_i32_1 = arith.constant 0 : i32
    return %c0_i32, %c0_i32_0 : i32, i32
  }
  func.func @transform_7(%arg0: i32) -> (i32, i32) {
    %c0_i32 = arith.constant 0 : i32
    %c0_i32_0 = arith.constant 0 : i32
    return %arg0, %c0_i32 : i32, i32
  }
}

</mosaic_0001>

<bundles_post_ra>
// kernel: tpu_custom_call.1
= control target key start
LH: loop header
LB: loop body
LE: loop exit
PB: predicated region body
PF: predicated region fallthrough
CT: control target
= control target key end

     0   :  { %12 = vsyncpa [#allocation3], 0  ;;  %s1221_s0 = inlined_call_operand.vmem [shape: f32[48,32], index: 0, kind: input, shape index: {}]   ;;  %s1222_s1 = inlined_call_operand.vmem [shape: bf16[32,128], index: 1, kind: input, shape index: {}]   ;;  %s1223_s2 = inlined_call_operand.vmem [shape: f32[1,128], index: 2, kind: input, shape index: {}]   ;;  %s1224_s3 = inlined_call_operand.vmem [shape: bf16[128,128], index: 3, kind: input, shape index: {}]   ;;  %s1225_s4 = inlined_call_operand.vmem [shape: f32[1,128], index: 4, kind: input, shape index: {}]   ;;  %s1226_s5 = inlined_call_operand.hbm [shape: bf16[128,128], index: 5, kind: input, shape index: {}]   ;;  %s1227_s6 = inlined_call_operand.vmem [shape: f32[1,128], index: 6, kind: input, shape index: {}]   ;;  %s1228_s7 = inlined_call_operand.hbm [shape: f32[48,128], index: 7, kind: output, shape index: {}]  }
   0x1   :  { %13 = vsyncpa [#allocation4], 0 }
   0x2   :  { %15 = vsyncpa [#allocation4 + $0x1], 0  ;;  %s1045_s24 = smov 0   ;;  %s1047_s25 = smov 0  }
   0x3   :  { %s1049_s26 = smov 0   ;;  %s1051_s27 = smov 0  }
   0x4 LB: > { %s1066_s28 = sadd.s32 4294967295, %s997_s27   ;;  %s716_s29 = sadd.s32 4294967294, %s997_s27   ;;  %s997_s27 = sphi %s1051_s27, %s1244_s27   ;;  %s993_s26 = sphi %s1049_s26, %s1243_s26   ;;  %s989_s25 = sphi %s1047_s25, %s1242_s25   ;;  %s985_s24 = sphi %s1045_s24, %s1241_s24  }
   0x5   : > { %s1070_s30 = sadd.s32 1, %s997_s27   ;;  %s180_s8 = sadd.s32 1, %s993_s26 }
   0x6   : > { %s177_s9 = ssub.s32 %s997_s27, %s1070_s30  ;;  %p190_p0 = scmp.ne.s32.totalorder %s993_s26, %s989_s25 }
   0x7   : > { %p178_p1 = scmp.eq.s32.totalorder %s177_s9, 0  ;;  %p191_p2 = scmp.eq.s32.totalorder %s1066_s28, 1 }
   0x8   : > { %p196_p3 = scmp.ne.s32.totalorder %s989_s25, %s985_s24  ;;  %p197_p4 = scmp.eq.s32.totalorder %s716_s29, 1 }
   0x9   : > { %s1081_s10 = scalar_select %p178_p1, %s993_s26, %s180_s8  }
   0xa   : > { %p1083_p5 = por %p191_p2, %p190_p0  ;;  %p1087_p6 = por %p197_p4, %p196_p3 }
   0xb   : > { %p717_p7 = scmp.ge.s32.totalorder %s997_s27, 1  ;;  %p204_p8 = scmp.lt.s32.totalorder %s997_s27, 3 }
   0xc   : > { %s1232_s11 = scalar_select %p1083_p5, 1, 0 }
   0xd   : > { %s1233_s12 = scalar_select %p1087_p6, 1, 0 }
   0xe   : > { %p1229_p9 = scmp.eq.s32.totalorder %s1066_s28, 0  ;;  %p1094_p10 = pnand %p717_p7, %p204_p8 }
   0xf   : > { %s999_s14 = smov [#allocation2]   ;;  %s903_s19 = scalar_lea.hbm %s1226_s5, 1024 }
  0x10   : > { %s1234_s13 = scalar_select %p1094_p10, 1, 0 }
  0x11   : > { %s228_s15 = sshll.u32 %s999_s14, 4  ;;  %p829_p11 = pneg %p1094_p10  ;;  %s229_s15 = int_to_ptr.vmem [resolvable:$true] %s228_s15 }
  0x12   : > { %p904_p13 = scmp.ne.s32.totalorder %s1226_s5, %s903_s19  ;;  %p910_p3 = scmp.lt.u32.totalorder %s903_s19, %s1226_s5 }
  0x13   : > { %p1102_p12 = pnand %p1229_p9, %p829_p11 }
  0x15   : > { %p905_p0 = pneg %p1102_p12 }
  0x17   : > { %p906_p1 = pnand %p905_p0, %p904_p13 }
  0x19   : > { %p907_p2 = pneg %p906_p1 }
  0x1b   : > { %p912_p4 = pnand %p910_p3, %p907_p2 }
  0x1d   : > { %915 = shalt.err (!%p912_p4)
}
  0x1e   : > { %s916_s29 = scalar_lea.vmem %s229_s15, 1024  ;;  %p924_p9 = scmp.lt.s32.totalorder %s229_s15, %s229_s15 }
  0x1f   : > { %p917_p7 = scmp.ne.s32.totalorder %s229_s15, %s916_s29  ;;  %p925_p6 = scmp.lt.s32.totalorder %s916_s29, %s916_s29 }
  0x21   : > { %p919_p8 = pnand %p917_p7, %p905_p0  ;;  %p926_p5 = por %p925_p6, %p924_p9 }
  0x23   : > { %p920_p11 = pneg %p919_p8 }
  0x25   : > { %p927_p10 = pnand %p926_p5, %p920_p11 }
  0x27   : > { %930 = shalt.err (!%p927_p10)
}
  0x28   : > { %s1000_s8 = smov 64   ;;  %s1001_s9 = smov 4  }
  0x29   : > { %832 = dma.hbm_to_vmem [thread:$0]  (!%p1102_p12), %s1226_s5, 1024, %s229_s15, [#allocation3], %s1000_s8, %s1000_s8, %s1001_s9  }
  0x2a   : > { %p1236_p13 = scmp.ne.s32.totalorder %s1234_s13, 0 }
  0x2b   : > { %p1237_p1 = scmp.eq.s32.totalorder (!%p1236_p13), %s1066_s28, 0 }
  0x2c   : > { %256 = sbr.rel (%p1236_p13) target bundleno = 759 (0x2f7), region = 48 }
  0x33   : > { %976 = dma.done.wait (%p1237_p1), [#allocation3], 1024   ;;  %p1238_p0 = pmov %p1237_p1 }
  0x34   : > { %s288_s18 = smul.u32 3, %s1066_s28  ;;  %v877_v0 = vld [vmem:[%s1222_s1] sm:$0xff]   ;;  %v878_v1 = vld [vmem:[%s1222_s1 + $0x8] sm:$0xff]   ;;  %vm324_vm0 = vcmask 261120   ;;  %v881_v8 = vld [vmem:[%s1224_s3 + $0x10] sm:$0xff]   ;;  %p1239_p9 = scmp.ne.s32.totalorder %s1232_s11, 0 }
  0x35   : > { %978 = vsyncadd (%p1238_p0), [#allocation3], 4294966272  ;;  %774 = vmatprep.subr.bf16.mxu0 %v877_v0  ;;  %v879_v6 = vld [vmem:[%s1224_s3] sm:$0xff]   ;;  %v880_v7 = vld [vmem:[%s1224_s3 + $0x8] sm:$0xff]   ;;  %s749_s15 = smul.u32 384, %s1066_s28  ;;  %s1002_s14 = smov [#allocation5]  }
  0x36   : > { %p289_p5 = scmp.lt.s32.totalorder %s288_s18, 5  ;;  %775 = vmatpush3.bf16.msra.mxu0 %v877_v0  ;;  %782 = vmatprep.subr.bf16.mxu1 %v879_v6  ;;  %v882_v10 = vld [vmem:[%s1224_s3 + $0x18] sm:$0xff]   ;;  %v883_v11 = vld [vmem:[%s1224_s3 + $0x20] sm:$0xff]   ;;  %v884_v12 = vld [vmem:[%s1224_s3 + $0x28] sm:$0xff]   ;;  %s935_s17 = sshll.u32 %s1002_s14, 4  ;;  %s936_s17 = int_to_ptr.vmem [resolvable:$false] %s935_s17 }
  0x37   : > { %776 = vmatprep.subr.bf16.mxu0 %v878_v1  ;;  %783 = vmatpush3.bf16.msra.mxu1 %v879_v6  ;;  %v885_v13 = vld [vmem:[%s1224_s3 + $0x30] sm:$0xff]   ;;  %v886_v14 = vld [vmem:[%s1224_s3 + $0x38] sm:$0xff]   ;;  %v887_v15 = vld [vmem:[#allocation2] sm:$0xff]   ;;  %s1178_s8 = scalar_lea.hbm %s1228_s7, %s749_s15 }
  0x38   : > { %s1246_s18 = smov (!%p289_p5, %s288_s18), 5  ;;  %784 = vmatprep.subr.bf16.mxu1 %v880_v7  ;;  %v888_v16 = vld [vmem:[#allocation2 + $0x8] sm:$0xff]   ;;  %v889_v17 = vld [vmem:[#allocation2 + $0x10] sm:$0xff]   ;;  %v723_v18 = vld [vmem:[%s1223_s2] ss:$0 sm:$0xff] }
  0x39   : > { %s722_s19 = sshll.u32 %s1246_s18, 3  ;;  %v890_v30 = vld [vmem:[#allocation2 + $0x18] sm:$0xff]   ;;  %v891_v31 = vld [vmem:[#allocation2 + $0x20] sm:$0xff]   ;;  %v892_v32 = vld [vmem:[#allocation2 + $0x28] sm:$0xff]   ;;  %s937_s18 = scalar_lea.vmem %s936_s17, 768 }
  0x3a   : > { %s292_s13 = scalar_lea.vmem %s1221_s0, %s722_s19  ;;  %777 = vmatpush3.bf16.msra.mxu0 %v878_v1  ;;  %v893_v33 = vld [vmem:[#allocation2 + $0x30] sm:$0xff]   ;;  %v894_v34 = vld [vmem:[#allocation2 + $0x38] sm:$0xff]   ;;  %v728_v35 = vld [vmem:[%s1225_s4] ss:$0 sm:$0xff]  ;;  %s285_s19 = sand.u32 1, %s989_s25  }
  0x3b   : > { %v296_v2 = vld [vmem:[%s292_s13] sm:$0xff]  ;;  %v297_v3 = vld [vmem:[%s292_s13 + $0x8] sm:$0xff]  ;;  %v298_v4 = vld [vmem:[%s292_s13 + $0x10] sm:$0xff]  ;;  %785 = vmatpush3.bf16.msra.mxu1 %v880_v7  ;;  %802 = vmatprep.subr.bf16.mxu0 %v887_v15  ;;  %s822_s20 = smul.u32 24, %s285_s19  ;;  %s1180_s28 = scalar_lea.sflag [#allocation4], %s285_s19 }
  0x3c   : > { %v299_v5 = vpack.c.bf16 %v297_v3, %v296_v2  ;;  %v300_v9 = vpack.c.bf16 %v298_v4, %v298_v4  ;;  %786 = vmatprep.subr.bf16.mxu1 %v881_v8  ;;  %v737_v47 = vld [vmem:[%s1227_s6] ss:$0 sm:$0xff] }
  0x3d   : > { %s287_s13 = scalar_lea.vmem [#allocation5], %s822_s20 }
  0x3e   : > { %778 = vmatprep.mubr.msk.bf16.mxu0 %vm324_vm0, %v299_v5  ;;  %s642_s22 = sshll.u32 %s287_s13, 4  ;;  %s1173_s22 = int_to_ptr.vmem [resolvable:$true] %s642_s22 }
  0x3f   : > { %779 = vmatmul.mubr.msk.bf16.vlgmr.msra.gmra.mrb[0].mxu0 %vm324_vm0, %v300_v9  ;;  %787 = vmatpush3.bf16.msra.mxu1 %v881_v8  ;;  %s931_s9 = scalar_lea.vmem %s1173_s22, 384  ;;  %p938_p2 = scmp.lt.s32.totalorder %s1173_s22, %s936_s17 }
  0x40   : > { %788 = vmatprep.subr.bf16.mxu1 %v882_v10  ;;  %803 = vmatpush3.bf16.msra.mxu0 %v887_v15  ;;  %p932_p6 = scmp.ne.s32.totalorder %s1173_s22, %s931_s9  ;;  %p939_p3 = scmp.lt.s32.totalorder %s937_s18, %s931_s9 }
  0x41   : > { %804 = vmatprep.subr.bf16.mxu0 %v888_v16 }
  0x42   : > { %p933_p10 = pnand %p932_p6, %p1239_p9  ;;  %p940_p4 = por %p939_p3, %p938_p2 }
  0x43   : > { %789 = vmatpush3.bf16.msra.mxu1 %v882_v10 }
  0x44   : > { %790 = vmatprep.subr.bf16.mxu1 %v883_v11  ;;  %805 = vmatpush3.bf16.msra.mxu0 %v888_v16  ;;  %p934_p12 = pneg %p933_p10 }
  0x45   : > { %806 = vmatprep.subr.bf16.mxu0 %v889_v17 }
  0x46   : > { %p941_p7 = pnand %p940_p4, %p934_p12 }
  0x47   : > { %791 = vmatpush3.bf16.msra.mxu1 %v883_v11 }
  0x48   : > { %792 = vmatprep.subr.bf16.mxu1 %v884_v12  ;;  %807 = vmatpush3.bf16.msra.mxu0 %v889_v17 }
  0x49   : > { %808 = vmatprep.subr.bf16.mxu0 %v890_v30 }
  0x4b   : > { %793 = vmatpush3.bf16.msra.mxu1 %v884_v12 }
  0x4c   : > { %794 = vmatprep.subr.bf16.mxu1 %v885_v13  ;;  %809 = vmatpush3.bf16.msra.mxu0 %v890_v30 }
  0x4d   : > { %810 = vmatprep.subr.bf16.mxu0 %v891_v31 }
  0x4f   : > { %795 = vmatpush3.bf16.msra.mxu1 %v885_v13 }
  0x50   : > { %796 = vmatprep.subr.bf16.mxu1 %v886_v14  ;;  %811 = vmatpush3.bf16.msra.mxu0 %v891_v31 }
  0x51   : > { %812 = vmatprep.subr.bf16.mxu0 %v892_v32 }
  0x53   : > { %797 = vmatpush3.bf16.msra.mxu1 %v886_v14 }
  0x54   : > { %813 = vmatpush3.bf16.msra.mxu0 %v892_v32 }
  0x55   : > { %814 = vmatprep.subr.bf16.mxu0 %v893_v33 }
  0x58   : > { %815 = vmatpush3.bf16.msra.mxu0 %v893_v33 }
  0x59   : > { %816 = vmatprep.subr.bf16.mxu0 %v894_v34 }
  0x5c   : > { %817 = vmatpush3.bf16.msra.mxu0 %v894_v34 }
 0x112   : > { %v780_v19 = vpop.f32.mrb[0].mxu0 }
 0x113   : > { %v374_v20 = vadd.f32 %v780_v19, %v723_v18  ;;  %v365_v21 = vpop.f32.mrb[1].mxu0 }
 0x114   : > { %v781_v22 = vpop.f32.mrb[2].mxu0  ;;  %v366_v24 = vadd.f32 %v723_v18, %v365_v21 }
 0x115   : > { %v368_v23 = vpop.f32.mrb[3].mxu0  ;;  %v380_v26 = vpack.c.bf16 %v374_v20, %v374_v20 }
 0x116   : > { %v369_v25 = vadd.f32 %v723_v18, %v368_v23 }
 0x118   : > { %v379_v27 = vpack.c.bf16 %v369_v25, %v366_v24 }
 0x11a   : > { %895 = vtanh.bf16 %v379_v27 }
 0x11b   : > { %897 = vtanh.bf16 %v380_v26 }
 0x125   : > { %v896_v28 = vpop.eup %895 }
 0x126   : > { %v898_v29 = vpop.eup %897  ;;  %798 = vmatprep.mubr.bf16.mxu1 %v896_v28 }
 0x127   : > { %799 = vmatmul.mubr.bf16.vlgmr.msra.gmra.mrb[0].mxu1 %v898_v29 }
 0x1fa   : > { %v800_v36 = vpop.f32.mrb[0].mxu1 }
 0x1fb   : > { %v497_v37 = vadd.f32 %v800_v36, %v728_v35  ;;  %v488_v38 = vpop.f32.mrb[1].mxu1 }
 0x1fc   : > { %v801_v39 = vpop.f32.mrb[2].mxu1  ;;  %v489_v41 = vadd.f32 %v728_v35, %v488_v38 }
 0x1fd   : > { %v491_v40 = vpop.f32.mrb[3].mxu1  ;;  %v503_v43 = vpack.c.bf16 %v497_v37, %v497_v37 }
 0x1fe   : > { %v492_v42 = vadd.f32 %v728_v35, %v491_v40 }
 0x200   : > { %v502_v44 = vpack.c.bf16 %v492_v42, %v489_v41 }
 0x202   : > { %899 = vtanh.bf16 %v502_v44 }
 0x203   : > { %901 = vtanh.bf16 %v503_v43 }
 0x20d   : > { %v900_v45 = vpop.eup %899 }
 0x20e   : > { %v902_v46 = vpop.eup %901  ;;  %818 = vmatprep.mubr.bf16.mxu0 %v900_v45 }
 0x20f   : > { %819 = vmatmul.mubr.bf16.vlgmr.msra.gmra.mrb[4].mxu0 %v902_v46 }
 0x2e2   : > { %v820_v48 = vpop.f32.mrb[4].mxu0 }
 0x2e3   : > { %v620_v49 = vadd.f32 %v820_v48, %v737_v47  ;;  %v611_v50 = vpop.f32.mrb[5].mxu0 }
 0x2e4   : > { %v612_v51 = vadd.f32 %v737_v47, %v611_v50  ;;  %v821_v52 = vpop.f32.mrb[6].mxu0 }
 0x2e5   : > { %627 = vst [vmem:[%s287_s13 + $0x10] sm:$0xff] %v620_v49  ;;  %v614_v53 = vpop.f32.mrb[7].mxu0 }
 0x2e6   : > { %625 = vst [vmem:[%s287_s13] sm:$0xff] %v612_v51  ;;  %v615_v54 = vadd.f32 %v737_v47, %v614_v53 }
 0x2e8   : > { %626 = vst [vmem:[%s287_s13 + $0x8] sm:$0xff] %v615_v54 }
 0x2e9   : > { %944 = shalt.err (!%p941_p7)
}
 0x2ea   : > { %s945_s19 = scalar_lea.hbm %s1178_s8, 384  ;;  %s949_s21 = scalar_lea.hbm %s1228_s7, 768 }
 0x2eb   : > { %p946_p8 = scmp.ne.s32.totalorder %s1178_s8, %s945_s19  ;;  %p950_p1 = scmp.lt.u32.totalorder %s1178_s8, %s1228_s7 }
 0x2ec   : > { %p951_p0 = scmp.lt.u32.totalorder %s949_s21, %s945_s19  ;;  %p953_p6 = scmp.lt.u32.totalorder %s945_s19, %s1178_s8 }
 0x2ed   : > { %p947_p11 = pnand %p946_p8, %p1239_p9 }
 0x2ee   : > { %p952_p5 = por %p951_p0, %p950_p1 }
 0x2ef   : > { %p948_p13 = pneg %p947_p11 }
 0x2f0   : > { %p954_p10 = por %p953_p6, %p952_p5 }
 0x2f2   : > { %p955_p12 = pnand %p954_p10, %p948_p13 }
 0x2f4   : > { %958 = shalt.err (!%p955_p12)
}
 0x2f5   : > { %s1003_s23 = smov 128   ;;  %s1004_s29 = smov 8  }
 0x2f6   : > { %827 = dma.vmem_to_hbm [thread:$0]  (%p1239_p9), %s1173_s22, 384, %s1178_s8, %s1180_s28, %s1003_s23, %s1003_s23, %s1004_s29  }
 0x2f7 PF: > { %p839_p2 = scmp.ge.s32.totalorder %s997_s27, 2  ;;  %s657_s9 = sand.u32 1, %s985_s24  }
 0x2f8   : > { %p1240_p3 = scmp.ne.s32.totalorder %s1233_s12, 0  ;;  %s658_s14 = scalar_lea.sflag [#allocation4], %s657_s9 }
 0x2fa   : > { %p834_p4 = pnand %p839_p2, %p1240_p3 }
 0x2fc   : > { %980 = dma.done.wait (!%p834_p4), %s658_s14, 384  }
 0x2fd   : > { %982 = vsyncadd (!%p834_p4), %s658_s14, 4294966912  ;;  %p18_p7 = scmp.ge.s32.totalorder %s1070_s30, 4   ;;  %s1241_s24 = smov %s989_s25 }
 0x2fe   : > { %s1242_s25 = smov %s993_s26  ;;  %s1243_s26 = smov %s1081_s10 }
 0x2ff   : > { %s1244_s27 = smov %s1070_s30  ;;  %20 = sbr.rel (!%p18_p7) target bundleno = 4 (0x4), region = 88 }
 0x306   :  { %663 = vsyncpa [#allocation3], 1 }
 0x307   :  { %665 = vsyncpa [#allocation3 + $0x1], 1 }
 0x308   :  { %666 = vsyncpa [#allocation4], 1 }
 0x309   :  { %668 = vsyncpa [#allocation4 + $0x1], 1 }

// kernel: tpu_custom_call.1
= control target key start
LH: loop header
LB: loop body
LE: loop exit
PB: predicated region body
PF: predicated region fallthrough
CT: control target
= control target key end

     0   :  { %12 = vsyncpa [#allocation3], 0  ;;  %s1221_s0 = inlined_call_operand.vmem [shape: f32[48,32], index: 0, kind: input, shape index: {}]   ;;  %s1222_s1 = inlined_call_operand.vmem [shape: bf16[32,128], index: 1, kind: input, shape index: {}]   ;;  %s1223_s2 = inlined_call_operand.vmem [shape: f32[1,128], index: 2, kind: input, shape index: {}]   ;;  %s1224_s3 = inlined_call_operand.vmem [shape: bf16[128,128], index: 3, kind: input, shape index: {}]   ;;  %s1225_s4 = inlined_call_operand.vmem [shape: f32[1,128], index: 4, kind: input, shape index: {}]   ;;  %s1226_s5 = inlined_call_operand.hbm [shape: bf16[128,128], index: 5, kind: input, shape index: {}]   ;;  %s1227_s6 = inlined_call_operand.vmem [shape: f32[1,128], index: 6, kind: input, shape index: {}]   ;;  %s1228_s7 = inlined_call_operand.hbm [shape: f32[48,128], index: 7, kind: output, shape index: {}]  }
   0x1   :  { %13 = vsyncpa [#allocation4], 0 }
   0x2   :  { %15 = vsyncpa [#allocation4 + $0x1], 0  ;;  %s1045_s24 = smov 0   ;;  %s1047_s25 = smov 0  }
   0x3   :  { %s1049_s26 = smov 0   ;;  %s1051_s27 = smov 0  }
   0x4 LB: > { %s1066_s28 = sadd.s32 4294967295, %s997_s27   ;;  %s716_s29 = sadd.s32 4294967294, %s997_s27   ;;  %s997_s27 = sphi %s1051_s27, %s1244_s27   ;;  %s993_s26 = sphi %s1049_s26, %s1243_s26   ;;  %s989_s25 = sphi %s1047_s25, %s1242_s25   ;;  %s985_s24 = sphi %s1045_s24, %s1241_s24  }
   0x5   : > { %s1070_s30 = sadd.s32 1, %s997_s27   ;;  %s180_s8 = sadd.s32 1, %s993_s26 }
   0x6   : > { %s177_s9 = ssub.s32 %s997_s27, %s1070_s30  ;;  %p190_p0 = scmp.ne.s32.totalorder %s993_s26, %s989_s25 }
   0x7   : > { %p178_p1 = scmp.eq.s32.totalorder %s177_s9, 0  ;;  %p191_p2 = scmp.eq.s32.totalorder %s1066_s28, 1 }
   0x8   : > { %p196_p3 = scmp.ne.s32.totalorder %s989_s25, %s985_s24  ;;  %p197_p4 = scmp.eq.s32.totalorder %s716_s29, 1 }
   0x9   : > { %s1081_s10 = scalar_select %p178_p1, %s993_s26, %s180_s8  }
   0xa   : > { %p1083_p5 = por %p191_p2, %p190_p0  ;;  %p1087_p6 = por %p197_p4, %p196_p3 }
   0xb   : > { %p717_p7 = scmp.ge.s32.totalorder %s997_s27, 1  ;;  %p204_p8 = scmp.lt.s32.totalorder %s997_s27, 3 }
   0xc   : > { %s1232_s11 = scalar_select %p1083_p5, 1, 0 }
   0xd   : > { %s1233_s12 = scalar_select %p1087_p6, 1, 0 }
   0xe   : > { %p1229_p9 = scmp.eq.s32.totalorder %s1066_s28, 0  ;;  %p1094_p10 = pnand %p717_p7, %p204_p8 }
   0xf   : > { %s999_s14 = smov [#allocation2]   ;;  %s903_s19 = scalar_lea.hbm %s1226_s5, 1024 }
  0x10   : > { %s1234_s13 = scalar_select %p1094_p10, 1, 0 }
  0x11   : > { %s228_s15 = sshll.u32 %s999_s14, 4  ;;  %p829_p11 = pneg %p1094_p10  ;;  %s229_s15 = int_to_ptr.vmem [resolvable:$true] %s228_s15 }
  0x12   : > { %p904_p13 = scmp.ne.s32.totalorder %s1226_s5, %s903_s19  ;;  %p910_p3 = scmp.lt.u32.totalorder %s903_s19, %s1226_s5 }
  0x13   : > { %p1102_p12 = pnand %p1229_p9, %p829_p11 }
  0x15   : > { %p905_p0 = pneg %p1102_p12 }
  0x17   : > { %p906_p1 = pnand %p905_p0, %p904_p13 }
  0x19   : > { %p907_p2 = pneg %p906_p1 }
  0x1b   : > { %p912_p4 = pnand %p910_p3, %p907_p2 }
  0x1d   : > { %915 = shalt.err (!%p912_p4)
}
  0x1e   : > { %s916_s29 = scalar_lea.vmem %s229_s15, 1024  ;;  %p924_p9 = scmp.lt.s32.totalorder %s229_s15, %s229_s15 }
  0x1f   : > { %p917_p7 = scmp.ne.s32.totalorder %s229_s15, %s916_s29  ;;  %p925_p6 = scmp.lt.s32.totalorder %s916_s29, %s916_s29 }
  0x21   : > { %p919_p8 = pnand %p917_p7, %p905_p0  ;;  %p926_p5 = por %p925_p6, %p924_p9 }
  0x23   : > { %p920_p11 = pneg %p919_p8 }
  0x25   : > { %p927_p10 = pnand %p926_p5, %p920_p11 }
  0x27   : > { %930 = shalt.err (!%p927_p10)
}
  0x28   : > { %s1000_s8 = smov 64   ;;  %s1001_s9 = smov 4  }
  0x29   : > { %832 = dma.hbm_to_vmem [thread:$0]  (!%p1102_p12), %s1226_s5, 1024, %s229_s15, [#allocation3], %s1000_s8, %s1000_s8, %s1001_s9  }
  0x2a   : > { %p1236_p13 = scmp.ne.s32.totalorder %s1234_s13, 0 }
  0x2b   : > { %p1237_p1 = scmp.eq.s32.totalorder (!%p1236_p13), %s1066_s28, 0 }
  0x2c   : > { %256 = sbr.rel (%p1236_p13) target bundleno = 759 (0x2f7), region = 48 }
  0x33   : > { %976 = dma.done.wait (%p1237_p1), [#allocation3], 1024   ;;  %p1238_p0 = pmov %p1237_p1 }
  0x34   : > { %s288_s18 = smul.u32 3, %s1066_s28  ;;  %v877_v0 = vld [vmem:[%s1222_s1] sm:$0xff]   ;;  %v878_v1 = vld [vmem:[%s1222_s1 + $0x8] sm:$0xff]   ;;  %vm324_vm0 = vcmask 261120   ;;  %v881_v8 = vld [vmem:[%s1224_s3 + $0x10] sm:$0xff]   ;;  %p1239_p9 = scmp.ne.s32.totalorder %s1232_s11, 0 }
  0x35   : > { %978 = vsyncadd (%p1238_p0), [#allocation3], 4294966272  ;;  %774 = vmatprep.subr.bf16.mxu0 %v877_v0  ;;  %v879_v6 = vld [vmem:[%s1224_s3] sm:$0xff]   ;;  %v880_v7 = vld [vmem:[%s1224_s3 + $0x8] sm:$0xff]   ;;  %s749_s15 = smul.u32 384, %s1066_s28  ;;  %s1002_s14 = smov [#allocation5]  }
  0x36   : > { %p289_p5 = scmp.lt.s32.totalorder %s288_s18, 5  ;;  %775 = vmatpush3.bf16.msra.mxu0 %v877_v0  ;;  %782 = vmatprep.subr.bf16.mxu1 %v879_v6  ;;  %v882_v10 = vld [vmem:[%s1224_s3 + $0x18] sm:$0xff]   ;;  %v883_v11 = vld [vmem:[%s1224_s3 + $0x20] sm:$0xff]   ;;  %v884_v12 = vld [vmem:[%s1224_s3 + $0x28] sm:$0xff]   ;;  %s935_s17 = sshll.u32 %s1002_s14, 4  ;;  %s936_s17 = int_to_ptr.vmem [resolvable:$false] %s935_s17 }
  0x37   : > { %776 = vmatprep.subr.bf16.mxu0 %v878_v1  ;;  %783 = vmatpush3.bf16.msra.mxu1 %v879_v6  ;;  %v885_v13 = vld [vmem:[%s1224_s3 + $0x30] sm:$0xff]   ;;  %v886_v14 = vld [vmem:[%s1224_s3 + $0x38] sm:$0xff]   ;;  %v887_v15 = vld [vmem:[#allocation2] sm:$0xff]   ;;  %s1178_s8 = scalar_lea.hbm %s1228_s7, %s749_s15 }
  0x38   : > { %s1246_s18 = smov (!%p289_p5, %s288_s18), 5  ;;  %784 = vmatprep.subr.bf16.mxu1 %v880_v7  ;;  %v888_v16 = vld [vmem:[#allocation2 + $0x8] sm:$0xff]   ;;  %v889_v17 = vld [vmem:[#allocation2 + $0x10] sm:$0xff]   ;;  %v723_v18 = vld [vmem:[%s1223_s2] ss:$0 sm:$0xff] }
  0x39   : > { %s722_s19 = sshll.u32 %s1246_s18, 3  ;;  %v890_v30 = vld [vmem:[#allocation2 + $0x18] sm:$0xff]   ;;  %v891_v31 = vld [vmem:[#allocation2 + $0x20] sm:$0xff]   ;;  %v892_v32 = vld [vmem:[#allocation2 + $0x28] sm:$0xff]   ;;  %s937_s18 = scalar_lea.vmem %s936_s17, 768 }
  0x3a   : > { %s292_s13 = scalar_lea.vmem %s1221_s0, %s722_s19  ;;  %777 = vmatpush3.bf16.msra.mxu0 %v878_v1  ;;  %v893_v33 = vld [vmem:[#allocation2 + $0x30] sm:$0xff]   ;;  %v894_v34 = vld [vmem:[#allocation2 + $0x38] sm:$0xff]   ;;  %v728_v35 = vld [vmem:[%s1225_s4] ss:$0 sm:$0xff]  ;;  %s285_s19 = sand.u32 1, %s989_s25  }
  0x3b   : > { %v296_v2 = vld [vmem:[%s292_s13] sm:$0xff]  ;;  %v297_v3 = vld [vmem:[%s292_s13 + $0x8] sm:$0xff]  ;;  %v298_v4 = vld [vmem:[%s292_s13 + $0x10] sm:$0xff]  ;;  %785 = vmatpush3.bf16.msra.mxu1 %v880_v7  ;;  %802 = vmatprep.subr.bf16.mxu0 %v887_v15  ;;  %s822_s20 = smul.u32 24, %s285_s19  ;;  %s1180_s28 = scalar_lea.sflag [#allocation4], %s285_s19 }
  0x3c   : > { %v299_v5 = vpack.c.bf16 %v297_v3, %v296_v2  ;;  %v300_v9 = vpack.c.bf16 %v298_v4, %v298_v4  ;;  %786 = vmatprep.subr.bf16.mxu1 %v881_v8  ;;  %v737_v47 = vld [vmem:[%s1227_s6] ss:$0 sm:$0xff] }
  0x3d   : > { %s287_s13 = scalar_lea.vmem [#allocation5], %s822_s20 }
  0x3e   : > { %778 = vmatprep.mubr.msk.bf16.mxu0 %vm324_vm0, %v299_v5  ;;  %s642_s22 = sshll.u32 %s287_s13, 4  ;;  %s1173_s22 = int_to_ptr.vmem [resolvable:$true] %s642_s22 }
  0x3f   : > { %779 = vmatmul.mubr.msk.bf16.vlgmr.msra.gmra.mrb[0].mxu0 %vm324_vm0, %v300_v9  ;;  %787 = vmatpush3.bf16.msra.mxu1 %v881_v8  ;;  %s931_s9 = scalar_lea.vmem %s1173_s22, 384  ;;  %p938_p2 = scmp.lt.s32.totalorder %s1173_s22, %s936_s17 }
  0x40   : > { %788 = vmatprep.subr.bf16.mxu1 %v882_v10  ;;  %803 = vmatpush3.bf16.msra.mxu0 %v887_v15  ;;  %p932_p6 = scmp.ne.s32.totalorder %s1173_s22, %s931_s9  ;;  %p939_p3 = scmp.lt.s32.totalorder %s937_s18, %s931_s9 }
  0x41   : > { %804 = vmatprep.subr.bf16.mxu0 %v888_v16 }
  0x42   : > { %p933_p10 = pnand %p932_p6, %p1239_p9  ;;  %p940_p4 = por %p939_p3, %p938_p2 }
  0x43   : > { %789 = vmatpush3.bf16.msra.mxu1 %v882_v10 }
  0x44   : > { %790 = vmatprep.subr.bf16.mxu1 %v883_v11  ;;  %805 = vmatpush3.bf16.msra.mxu0 %v888_v16  ;;  %p934_p12 = pneg %p933_p10 }
  0x45   : > { %806 = vmatprep.subr.bf16.mxu0 %v889_v17 }
  0x46   : > { %p941_p7 = pnand %p940_p4, %p934_p12 }
  0x47   : > { %791 = vmatpush3.bf16.msra.mxu1 %v883_v11 }
  0x48   : > { %792 = vmatprep.subr.bf16.mxu1 %v884_v12  ;;  %807 = vmatpush3.bf16.msra.mxu0 %v889_v17 }
  0x49   : > { %808 = vmatprep.subr.bf16.mxu0 %v890_v30 }
  0x4b   : > { %793 = vmatpush3.bf16.msra.mxu1 %v884_v12 }
  0x4c   : > { %794 = vmatprep.subr.bf16.mxu1 %v885_v13  ;;  %809 = vmatpush3.bf16.msra.mxu0 %v890_v30 }
  0x4d   : > { %810 = vmatprep.subr.bf16.mxu0 %v891_v31 }
  0x4f   : > { %795 = vmatpush3.bf16.msra.mxu1 %v885_v13 }
  0x50   : > { %796 = vmatprep.subr.bf16.mxu1 %v886_v14  ;;  %811 = vmatpush3.bf16.msra.mxu0 %v891_v31 }
  0x51   : > { %812 = vmatprep.subr.bf16.mxu0 %v892_v32 }
  0x53   : > { %797 = vmatpush3.bf16.msra.mxu1 %v886_v14 }
  0x54   : > { %813 = vmatpush3.bf16.msra.mxu0 %v892_v32 }
  0x55   : > { %814 = vmatprep.subr.bf16.mxu0 %v893_v33 }
  0x58   : > { %815 = vmatpush3.bf16.msra.mxu0 %v893_v33 }
  0x59   : > { %816 = vmatprep.subr.bf16.mxu0 %v894_v34 }
  0x5c   : > { %817 = vmatpush3.bf16.msra.mxu0 %v894_v34 }
 0x112   : > { %v780_v19 = vpop.f32.mrb[0].mxu0 }
 0x113   : > { %v374_v20 = vadd.f32 %v780_v19, %v723_v18  ;;  %v365_v21 = vpop.f32.mrb[1].mxu0 }
 0x114   : > { %v781_v22 = vpop.f32.mrb[2].mxu0  ;;  %v366_v24 = vadd.f32 %v723_v18, %v365_v21 }
 0x115   : > { %v368_v23 = vpop.f32.mrb[3].mxu0  ;;  %v380_v26 = vpack.c.bf16 %v374_v20, %v374_v20 }
 0x116   : > { %v369_v25 = vadd.f32 %v723_v18, %v368_v23 }
 0x118   : > { %v379_v27 = vpack.c.bf16 %v369_v25, %v366_v24 }
 0x11a   : > { %895 = vtanh.bf16 %v379_v27 }
 0x11b   : > { %897 = vtanh.bf16 %v380_v26 }
 0x125   : > { %v896_v28 = vpop.eup %895 }
 0x126   : > { %v898_v29 = vpop.eup %897  ;;  %798 = vmatprep.mubr.bf16.mxu1 %v896_v28 }
 0x127   : > { %799 = vmatmul.mubr.bf16.vlgmr.msra.gmra.mrb[0].mxu1 %v898_v29 }
 0x1fa   : > { %v800_v36 = vpop.f32.mrb[0].mxu1 }
 0x1fb   : > { %v497_v37 = vadd.f32 %v800_v36, %v728_v35  ;;  %v488_v38 = vpop.f32.mrb[1].mxu1 }
 0x1fc   : > { %v801_v39 = vpop.f32.mrb[2].mxu1  ;;  %v489_v41 = vadd.f32 %v728_v35, %v488_v38 }
 0x1fd   : > { %v491_v40 = vpop.f32.mrb[3].mxu1  ;;  %v503_v43 = vpack.c.bf16 %v497_v37, %v497_v37 }
 0x1fe   : > { %v492_v42 = vadd.f32 %v728_v35, %v491_v40 }
 0x200   : > { %v502_v44 = vpack.c.bf16 %v492_v42, %v489_v41 }
 0x202   : > { %899 = vtanh.bf16 %v502_v44 }
 0x203   : > { %901 = vtanh.bf16 %v503_v43 }
 0x20d   : > { %v900_v45 = vpop.eup %899 }
 0x20e   : > { %v902_v46 = vpop.eup %901  ;;  %818 = vmatprep.mubr.bf16.mxu0 %v900_v45 }
 0x20f   : > { %819 = vmatmul.mubr.bf16.vlgmr.msra.gmra.mrb[4].mxu0 %v902_v46 }
 0x2e2   : > { %v820_v48 = vpop.f32.mrb[4].mxu0 }
 0x2e3   : > { %v620_v49 = vadd.f32 %v820_v48, %v737_v47  ;;  %v611_v50 = vpop.f32.mrb[5].mxu0 }
 0x2e4   : > { %v612_v51 = vadd.f32 %v737_v47, %v611_v50  ;;  %v821_v52 = vpop.f32.mrb[6].mxu0 }
 0x2e5   : > { %627 = vst [vmem:[%s287_s13 + $0x10] sm:$0xff] %v620_v49  ;;  %v614_v53 = vpop.f32.mrb[7].mxu0 }
 0x2e6   : > { %625 = vst [vmem:[%s287_s13] sm:$0xff] %v612_v51  ;;  %v615_v54 = vadd.f32 %v737_v47, %v614_v53 }
 0x2e8   : > { %626 = vst [vmem:[%s287_s13 + $0x8] sm:$0xff] %v615_v54 }
 0x2e9   : > { %944 = shalt.err (!%p941_p7)
}
 0x2ea   : > { %s945_s19 = scalar_lea.hbm %s1178_s8, 384  ;;  %s949_s21 = scalar_lea.hbm %s1228_s7, 768 }
 0x2eb   : > { %p946_p8 = scmp.ne.s32.totalorder %s1178_s8, %s945_s19  ;;  %p950_p1 = scmp.lt.u32.totalorder %s1178_s8, %s1228_s7 }
 0x2ec   : > { %p951_p0 = scmp.lt.u32.totalorder %s949_s21, %s945_s19  ;;  %p953_p6 = scmp.lt.u32.totalorder %s945_s19, %s1178_s8 }
 0x2ed   : > { %p947_p11 = pnand %p946_p8, %p1239_p9 }
 0x2ee   : > { %p952_p5 = por %p951_p0, %p950_p1 }
 0x2ef   : > { %p948_p13 = pneg %p947_p11 }
 0x2f0   : > { %p954_p10 = por %p953_p6, %p952_p5 }
 0x2f2   : > { %p955_p12 = pnand %p954_p10, %p948_p13 }
 0x2f4   : > { %958 = shalt.err (!%p955_p12)
}
 0x2f5   : > { %s1003_s23 = smov 128   ;;  %s1004_s29 = smov 8  }
 0x2f6   : > { %827 = dma.vmem_to_hbm [thread:$0]  (%p1239_p9), %s1173_s22, 384, %s1178_s8, %s1180_s28, %s1003_s23, %s1003_s23, %s1004_s29  }
 0x2f7 PF: > { %p839_p2 = scmp.ge.s32.totalorder %s997_s27, 2  ;;  %s657_s9 = sand.u32 1, %s985_s24  }
 0x2f8   : > { %p1240_p3 = scmp.ne.s32.totalorder %s1233_s12, 0  ;;  %s658_s14 = scalar_lea.sflag [#allocation4], %s657_s9 }
 0x2fa   : > { %p834_p4 = pnand %p839_p2, %p1240_p3 }
 0x2fc   : > { %980 = dma.done.wait (!%p834_p4), %s658_s14, 384  }
 0x2fd   : > { %982 = vsyncadd (!%p834_p4), %s658_s14, 4294966912  ;;  %p18_p7 = scmp.ge.s32.totalorder %s1070_s30, 4   ;;  %s1241_s24 = smov %s989_s25 }
 0x2fe   : > { %s1242_s25 = smov %s993_s26  ;;  %s1243_s26 = smov %s1081_s10 }
 0x2ff   : > { %s1244_s27 = smov %s1070_s30  ;;  %20 = sbr.rel (!%p18_p7) target bundleno = 4 (0x4), region = 88 }
 0x306   :  { %663 = vsyncpa [#allocation3], 1 }
 0x307   :  { %665 = vsyncpa [#allocation3 + $0x1], 1 }
 0x308   :  { %666 = vsyncpa [#allocation4], 1 }
 0x309   :  { %668 = vsyncpa [#allocation4 + $0x1], 1 }

</bundles_post_ra>
